<compile_context>
chip_gen: v7x
topology: tpu7x:2x2x1
jax: 0.10.0
libtpu: 0.0.40
codegen_flags: <defaults>
</compile_context>

<pallas_src>
import functools

import jax
import jax.numpy as jnp
from jax.experimental import pallas as pl
from jax.experimental.pallas import tpu as pltpu


def _round_up(n, m):
    return ((n + m - 1) // m) * m


def _leaky_relu(x, negative_slope=0.01):
    # matches torch.nn.LeakyReLU default negative_slope=0.01
    slope = jnp.asarray(negative_slope, x.dtype)
    return jnp.where(x >= 0, x, slope * x)


def _use_bf16_epilogue():
    """bf16 elementwise epilogues only where the VPU has bf16 lanes (v6e/v7x)."""
    try:
        kind = jax.devices()[0].device_kind.lower()
    except Exception:
        return False
    return ("v6" in kind) or ("v7" in kind)


def deepnn_kernel(x_ref,
                  w1_ref, b1_ref,
                  w2_ref, b2_ref,
                  w3_ref, b3_ref,
                  w4_ref, b4_ref,
                  o_ref, *, bf16_epilogue):
    # x arrives f32 straight from HBM (no wrapper astype pass); cast to bf16
    # here.  All dots accumulate in f32 on the MXU.
    x = x_ref[...].astype(jnp.bfloat16)

    def epilogue(acc_f32, b_ref):
        # bias add + LeakyReLU.  bf16 on v6e/v7x (halves the VALU passes over
        # the (TB, 512) slab), f32 on v5e (no bf16 VALU).  Either way the
        # result is bf16 so it feeds the next MXU dot directly.
        if bf16_epilogue:
            return _leaky_relu(acc_f32.astype(jnp.bfloat16) + b_ref[...])
        return _leaky_relu(acc_f32 + b_ref[...]).astype(jnp.bfloat16)

    # Linear(in, 512) + LeakyReLU
    h = epilogue(jnp.dot(x, w1_ref[...], preferred_element_type=jnp.float32), b1_ref)
    # Linear(512, 128) + LeakyReLU
    h = epilogue(jnp.dot(h, w2_ref[...], preferred_element_type=jnp.float32), b2_ref)
    # Linear(128, 64) + LeakyReLU
    h = epilogue(jnp.dot(h, w3_ref[...], preferred_element_type=jnp.float32), b3_ref)

    # Linear(64, 1) as a degenerate-N MXU dot, f32 bias, Sigmoid.
    logit = jnp.dot(h, w4_ref[...], preferred_element_type=jnp.float32) + b4_ref[...]
    o_ref[...] = jax.nn.sigmoid(logit).astype(o_ref.dtype)


@functools.partial(jax.jit, static_argnames=("tb", "bf16_epilogue"))
def _deepnn_forward(x, params, *, tb, bf16_epilogue):
    B, F = x.shape

    # Pad only to the sublane multiple (8), never to a full tile: avoids large
    # wrapper-side HBM copies and wasted grid work.  (No-op when B % 8 == 0.)
    Bp = _round_up(B, 8)
    if Bp != B:
        x = jnp.pad(x, ((0, Bp - B), (0, 0)))

    # Batch tile: large enough to amortize per-step overhead, capped at 4096 so
    # the fused intermediates stay well under the 32 MiB scoped-VMEM default
    # (v7x has only 64 MiB physical VMEM).
    TB = _round_up(min(min(tb, 4096), Bp), 8)
    # Guarantee >= 2 grid steps when possible so v7x's two TensorCores both get
    # work under dimension_semantics=("parallel",).
    if pl.cdiv(Bp, TB) == 1 and TB >= 16:
        TB = _round_up((TB + 1) // 2, 8)
    grid = (pl.cdiv(Bp, TB),)

    # MXU-facing weights in bf16; layer-1..3 biases in the epilogue dtype; the
    # final layer's bias / sigmoid stay f32 everywhere.
    ep_dtype = jnp.bfloat16 if bf16_epilogue else jnp.float32
    w1 = params["w1"].astype(jnp.bfloat16)
    w2 = params["w2"].astype(jnp.bfloat16)
    w3 = params["w3"].astype(jnp.bfloat16)
    w4 = params["w4"].astype(jnp.bfloat16)
    b1 = params["b1"].astype(ep_dtype)
    b2 = params["b2"].astype(ep_dtype)
    b3 = params["b3"].astype(ep_dtype)
    b4 = params["b4"].astype(jnp.float32)

    resident = lambda a: pl.BlockSpec(a.shape, lambda i: (0,) * a.ndim)

    flops = 2 * B * (F * 512 + 512 * 128 + 128 * 64 + 64 * 1)
    param_bytes = 2 * (F * 512 + 512 * 128 + 128 * 64 + 64) + 4 * (512 + 128 + 64 + 1)
    cost = pl.CostEstimate(
        flops=flops,
        transcendentals=B,                        # one sigmoid per row
        bytes_accessed=B * F * 4 + B * 4 + param_bytes,
    )

    kernel = functools.partial(deepnn_kernel, bf16_epilogue=bf16_epilogue)

    out = pl.pallas_call(
        kernel,
        out_shape=jax.ShapeDtypeStruct((Bp, 1), jnp.float32),
        grid=grid,
        in_specs=[
            pl.BlockSpec((TB, F), lambda i: (i, 0)),   # x: batch-tiled, f32 in HBM
            resident(w1), resident(b1),                # weights/biases VMEM-resident
            resident(w2), resident(b2),
            resident(w3), resident(b3),
            resident(w4), resident(b4),
        ],
        out_specs=pl.BlockSpec((TB, 1), lambda i: (i, 0)),
        compiler_params=pltpu.CompilerParams(
            dimension_semantics=("parallel",),          # megacore / v7x dual-TC
        ),
        cost_estimate=cost,
    )(x, w1, b1, w2, b2, w3, b3, w4, b4)

    return out[:B]


def deepnn_forward(x, params, *, tb=2048):
    """x: (B, in_features) float32. params: w1..w4 (in,out) and b1..b4 (1,out)."""
    return _deepnn_forward(x, params, tb=tb, bf16_epilogue=_use_bf16_epilogue())


def init_params(key, in_features):
    """Deterministic init mirroring torch Linear default U(-1/sqrt(in), 1/sqrt(in)).
    Weights stored as (in, out)."""
    dims = [(in_features, 512), (512, 128), (128, 64), (64, 1)]
    params = {}
    keys = jax.random.split(key, len(dims))
    for i, ((din, dout), k) in enumerate(zip(dims, keys), start=1):
        kw, kb = jax.random.split(k)
        bound = 1.0 / jnp.sqrt(jnp.float32(din))
        params[f"w{i}"] = jax.random.uniform(kw, (din, dout), jnp.float32, -bound, bound)
        params[f"b{i}"] = jax.random.uniform(kb, (1, dout), jnp.float32, -bound, bound)
    return params


def reference_forward(x, params, bf16_epilogue):
    """Pure-JAX reference mirroring the kernel's bf16/f32 numerics exactly."""
    ep = jnp.bfloat16 if bf16_epilogue else jnp.float32
    h = x.astype(jnp.bfloat16)
    for i in (1, 2, 3):
        w = params[f"w{i}"].astype(jnp.bfloat16)
        b = params[f"b{i}"].astype(ep)
        acc = jnp.dot(h, w, preferred_element_type=jnp.float32)
        a = (acc.astype(jnp.bfloat16) + b) if bf16_epilogue else (acc + b)
        a = jnp.where(a >= 0, a, jnp.asarray(0.01, a.dtype) * a)
        h = a.astype(jnp.bfloat16)
    logit = jnp.dot(h, params["w4"].astype(jnp.bfloat16),
                    preferred_element_type=jnp.float32) + params["b4"].astype(jnp.float32)
    return jax.nn.sigmoid(logit)


if __name__ == "__main__":
    key = jax.random.PRNGKey(0)
    k_x, k_p = jax.random.split(key)

    batch = 8
    in_features = 32
    x = jax.random.normal(k_x, (batch, in_features), jnp.float32)
    params = init_params(k_p, in_features)

    out = deepnn_forward(x, params)
    out = jax.block_until_ready(out)

    ref = reference_forward(x, params, _use_bf16_epilogue())
    assert out.shape == (batch, 1)
    assert bool(jnp.all(jnp.isfinite(out)))
    assert jnp.allclose(out, ref, atol=2e-3, rtol=2e-3), "mismatch vs JAX reference"
    # Precision contract: x / w1..w4 / inter-layer activations are bf16 with f32
    # MXU accumulation; expect ~1e-3-level deviation from a pure-f32 PyTorch run.

    print("KERNEL_OK")
</pallas_src>

<mosaic_0001>
module attributes {stable_mosaic.version = 11 : i64} {
  func.func @deepnn_kernel(%arg0: i32, %arg1: memref<8x32xf32, #tpu.memory_space<vmem>>, %arg2: memref<32x512xbf16, #tpu.memory_space<vmem>>, %arg3: memref<1x512xf32, #tpu.memory_space<vmem>>, %arg4: memref<512x128xbf16, #tpu.memory_space<vmem>>, %arg5: memref<1x128xf32, #tpu.memory_space<vmem>>, %arg6: memref<128x64xbf16, #tpu.memory_space<vmem>>, %arg7: memref<1x64xf32, #tpu.memory_space<vmem>>, %arg8: memref<64x1xbf16, #tpu.memory_space<vmem>>, %arg9: memref<1x1xf32, #tpu.memory_space<vmem>>, %arg10: memref<8x1xf32, #tpu.memory_space<vmem>>) attributes {dimension_semantics = [#tpu.dimension_semantics<parallel>], iteration_bounds = array<i64: 1>, scalar_prefetch = 0 : i64, scratch_operands = 0 : i64, tpu.core_type = #tpu.core_type<tc>, window_params = [{transform_indices = @transform_0, window_bounds = array<i64: 8, 32>}, {pipeline_mode = #tpu.pipeline_mode<synchronous>, transform_indices = @transform_1, window_bounds = array<i64: 32, 512>}, {pipeline_mode = #tpu.pipeline_mode<synchronous>, transform_indices = @transform_2, window_bounds = array<i64: 1, 512>}, {pipeline_mode = #tpu.pipeline_mode<synchronous>, transform_indices = @transform_3, window_bounds = array<i64: 512, 128>}, {pipeline_mode = #tpu.pipeline_mode<synchronous>, transform_indices = @transform_4, window_bounds = array<i64: 1, 128>}, {pipeline_mode = #tpu.pipeline_mode<synchronous>, transform_indices = @transform_5, window_bounds = array<i64: 128, 64>}, {pipeline_mode = #tpu.pipeline_mode<synchronous>, transform_indices = @transform_6, window_bounds = array<i64: 1, 64>}, {pipeline_mode = #tpu.pipeline_mode<synchronous>, transform_indices = @transform_7, window_bounds = array<i64: 64, 1>}, {pipeline_mode = #tpu.pipeline_mode<synchronous>, transform_indices = @transform_8, window_bounds = array<i64: 1, 1>}, {transform_indices = @transform_9, window_bounds = array<i64: 8, 1>}]} {
    %c0 = arith.constant 0 : index
    %c0_0 = arith.constant 0 : index
    %0 = vector.load %arg1[%c0, %c0_0] : memref<8x32xf32, #tpu.memory_space<vmem>>, vector<8x32xf32>
    %1 = arith.truncf %0 : vector<8x32xf32> to vector<8x32xbf16>
    %c0_1 = arith.constant 0 : index
    %c0_2 = arith.constant 0 : index
    %2 = vector.load %arg2[%c0_1, %c0_2] : memref<32x512xbf16, #tpu.memory_space<vmem>>, vector<32x512xbf16>
    %cst = arith.constant dense<0.000000e+00> : vector<8x512xf32>
    %3 = tpu.matmul %1, %2, %cst {dimension_numbers = #tpu.dot_dimension_numbers<[1], [0], [0], [1], [0, 0, 1, 1], [], []>} : vector<8x32xbf16>, vector<32x512xbf16>, vector<8x512xf32> -> vector<8x512xf32>
    %c0_3 = arith.constant 0 : index
    %c0_4 = arith.constant 0 : index
    %4 = vector.load %arg3[%c0_3, %c0_4] : memref<1x512xf32, #tpu.memory_space<vmem>>, vector<1x512xf32>
    %5 = vector.broadcast %4 : vector<1x512xf32> to vector<8x512xf32>
    %6 = arith.addf %3, %5 : vector<8x512xf32>
    %cst_5 = arith.constant 0.000000e+00 : f32
    %7 = vector.broadcast %cst_5 : f32 to vector<8x512xf32>
    %8 = arith.cmpf oge, %6, %7 : vector<8x512xf32>
    %cst_6 = arith.constant 0.00999999977 : f32
    %9 = vector.broadcast %cst_6 : f32 to vector<8x512xf32>
    %10 = arith.mulf %9, %6 : vector<8x512xf32>
    %11 = arith.select %8, %6, %10 : vector<8x512xi1>, vector<8x512xf32>
    %12 = arith.truncf %11 : vector<8x512xf32> to vector<8x512xbf16>
    %c0_7 = arith.constant 0 : index
    %c0_8 = arith.constant 0 : index
    %13 = vector.load %arg4[%c0_7, %c0_8] : memref<512x128xbf16, #tpu.memory_space<vmem>>, vector<512x128xbf16>
    %cst_9 = arith.constant dense<0.000000e+00> : vector<8x128xf32>
    %14 = tpu.matmul %12, %13, %cst_9 {dimension_numbers = #tpu.dot_dimension_numbers<[1], [0], [0], [1], [0, 0, 1, 1], [], []>} : vector<8x512xbf16>, vector<512x128xbf16>, vector<8x128xf32> -> vector<8x128xf32>
    %c0_10 = arith.constant 0 : index
    %c0_11 = arith.constant 0 : index
    %15 = vector.load %arg5[%c0_10, %c0_11] : memref<1x128xf32, #tpu.memory_space<vmem>>, vector<1x128xf32>
    %16 = vector.broadcast %15 : vector<1x128xf32> to vector<8x128xf32>
    %17 = arith.addf %14, %16 : vector<8x128xf32>
    %cst_12 = arith.constant 0.000000e+00 : f32
    %18 = vector.broadcast %cst_12 : f32 to vector<8x128xf32>
    %19 = arith.cmpf oge, %17, %18 : vector<8x128xf32>
    %cst_13 = arith.constant 0.00999999977 : f32
    %20 = vector.broadcast %cst_13 : f32 to vector<8x128xf32>
    %21 = arith.mulf %20, %17 : vector<8x128xf32>
    %22 = arith.select %19, %17, %21 : vector<8x128xi1>, vector<8x128xf32>
    %23 = arith.truncf %22 : vector<8x128xf32> to vector<8x128xbf16>
    %c0_14 = arith.constant 0 : index
    %c0_15 = arith.constant 0 : index
    %24 = vector.load %arg6[%c0_14, %c0_15] : memref<128x64xbf16, #tpu.memory_space<vmem>>, vector<128x64xbf16>
    %cst_16 = arith.constant dense<0.000000e+00> : vector<8x64xf32>
    %25 = tpu.matmul %23, %24, %cst_16 {dimension_numbers = #tpu.dot_dimension_numbers<[1], [0], [0], [1], [0, 0, 1, 1], [], []>} : vector<8x128xbf16>, vector<128x64xbf16>, vector<8x64xf32> -> vector<8x64xf32>
    %c0_17 = arith.constant 0 : index
    %c0_18 = arith.constant 0 : index
    %26 = vector.load %arg7[%c0_17, %c0_18] : memref<1x64xf32, #tpu.memory_space<vmem>>, vector<1x64xf32>
    %27 = vector.broadcast %26 : vector<1x64xf32> to vector<8x64xf32>
    %28 = arith.addf %25, %27 : vector<8x64xf32>
    %cst_19 = arith.constant 0.000000e+00 : f32
    %29 = vector.broadcast %cst_19 : f32 to vector<8x64xf32>
    %30 = arith.cmpf oge, %28, %29 : vector<8x64xf32>
    %cst_20 = arith.constant 0.00999999977 : f32
    %31 = vector.broadcast %cst_20 : f32 to vector<8x64xf32>
    %32 = arith.mulf %31, %28 : vector<8x64xf32>
    %33 = arith.select %30, %28, %32 : vector<8x64xi1>, vector<8x64xf32>
    %34 = arith.truncf %33 : vector<8x64xf32> to vector<8x64xbf16>
    %c0_21 = arith.constant 0 : index
    %c0_22 = arith.constant 0 : index
    %35 = vector.load %arg8[%c0_21, %c0_22] : memref<64x1xbf16, #tpu.memory_space<vmem>>, vector<64x1xbf16>
    %cst_23 = arith.constant dense<0.000000e+00> : vector<8x1xf32>
    %36 = tpu.matmul %34, %35, %cst_23 {dimension_numbers = #tpu.dot_dimension_numbers<[1], [0], [0], [1], [0, 0, 1, 1], [], []>} : vector<8x64xbf16>, vector<64x1xbf16>, vector<8x1xf32> -> vector<8x1xf32>
    %c0_24 = arith.constant 0 : index
    %c0_25 = arith.constant 0 : index
    %37 = vector.load %arg9[%c0_24, %c0_25] : memref<1x1xf32, #tpu.memory_space<vmem>>, vector<1x1xf32>
    %38 = vector.broadcast %37 : vector<1x1xf32> to vector<8x1xf32>
    %39 = arith.addf %36, %38 : vector<8x1xf32>
    %40 = arith.negf %39 : vector<8x1xf32>
    %41 = math.exp %40 : vector<8x1xf32>
    %cst_26 = arith.constant 1.000000e+00 : f32
    %42 = vector.broadcast %cst_26 : f32 to vector<8x1xf32>
    %43 = arith.addf %42, %41 : vector<8x1xf32>
    %44 = arith.divf %42, %43 : vector<8x1xf32>
    %c0_27 = arith.constant 0 : index
    %c0_28 = arith.constant 0 : index
    %45 = vector.load %arg10[%c0_27, %c0_28] : memref<8x1xf32, #tpu.memory_space<vmem>>, vector<8x1xf32>
    tpu.vector_store %arg10[%c0_27, %c0_28], %44 {strides = array<i32>} : memref<8x1xf32, #tpu.memory_space<vmem>>, vector<8x1xf32>,
    return
  }
  func.func @transform_0(%arg0: i32) -> (i32, i32) {
    %c0_i32 = arith.constant 0 : i32
    %c0_i32_0 = arith.constant 0 : i32
    return %arg0, %c0_i32 : i32, i32
  }
  func.func @transform_1(%arg0: i32) -> (i32, i32) {
    %c0_i32 = arith.constant 0 : i32
    %c0_i32_0 = arith.constant 0 : i32
    %c0_i32_1 = arith.constant 0 : i32
    return %c0_i32, %c0_i32_0 : i32, i32
  }
  func.func @transform_2(%arg0: i32) -> (i32, i32) {
    %c0_i32 = arith.constant 0 : i32
    %c0_i32_0 = arith.constant 0 : i32
    %c0_i32_1 = arith.constant 0 : i32
    return %c0_i32, %c0_i32_0 : i32, i32
  }
  func.func @transform_3(%arg0: i32) -> (i32, i32) {
    %c0_i32 = arith.constant 0 : i32
    %c0_i32_0 = arith.constant 0 : i32
    %c0_i32_1 = arith.constant 0 : i32
    return %c0_i32, %c0_i32_0 : i32, i32
  }
  func.func @transform_4(%arg0: i32) -> (i32, i32) {
    %c0_i32 = arith.constant 0 : i32
    %c0_i32_0 = arith.constant 0 : i32
    %c0_i32_1 = arith.constant 0 : i32
    return %c0_i32, %c0_i32_0 : i32, i32
  }
  func.func @transform_5(%arg0: i32) -> (i32, i32) {
    %c0_i32 = arith.constant 0 : i32
    %c0_i32_0 = arith.constant 0 : i32
    %c0_i32_1 = arith.constant 0 : i32
    return %c0_i32, %c0_i32_0 : i32, i32
  }
  func.func @transform_6(%arg0: i32) -> (i32, i32) {
    %c0_i32 = arith.constant 0 : i32
    %c0_i32_0 = arith.constant 0 : i32
    %c0_i32_1 = arith.constant 0 : i32
    return %c0_i32, %c0_i32_0 : i32, i32
  }
  func.func @transform_7(%arg0: i32) -> (i32, i32) {
    %c0_i32 = arith.constant 0 : i32
    %c0_i32_0 = arith.constant 0 : i32
    %c0_i32_1 = arith.constant 0 : i32
    return %c0_i32, %c0_i32_0 : i32, i32
  }
  func.func @transform_8(%arg0: i32) -> (i32, i32) {
    %c0_i32 = arith.constant 0 : i32
    %c0_i32_0 = arith.constant 0 : i32
    %c0_i32_1 = arith.constant 0 : i32
    return %c0_i32, %c0_i32_0 : i32, i32
  }
  func.func @transform_9(%arg0: i32) -> (i32, i32) {
    %c0_i32 = arith.constant 0 : i32
    %c0_i32_0 = arith.constant 0 : i32
    return %arg0, %c0_i32 : i32, i32
  }
}

</mosaic_0001>

<bundles_post_ra>
// kernel: _deepnn_forward.1
= control target key start
LH: loop header
LB: loop body
LE: loop exit
PB: predicated region body
PF: predicated region fallthrough
CT: control target
= control target key end

     0   :  { %v978_v1 = vmov 0   ;;  %vm107_vm0 = vcmask 261120   ;;  %v979_v43 = vmov 0.0   ;;  %v47_v44 = vlaneseq  ;;  %s1221_s1 = inlined_call_operand.vmem [shape: bf16[32,512], index: 1, kind: input, shape index: {}]   ;;  %s1222_s0 = inlined_call_operand.vmem [shape: f32[8,32], index: 0, kind: input, shape index: {}]   ;;  %s1223_s3 = inlined_call_operand.vmem [shape: bf16[512,128], index: 3, kind: input, shape index: {}]   ;;  %s1224_s5 = inlined_call_operand.vmem [shape: bf16[128,64], index: 5, kind: input, shape index: {}]   ;;  %s1225_s2 = inlined_call_operand.vmem [shape: f32[1,512], index: 2, kind: input, shape index: {}]   ;;  %s1226_s7 = inlined_call_operand.vmem [shape: bf16[64,1], index: 7, kind: input, shape index: {}]   ;;  %s1227_s4 = inlined_call_operand.vmem [shape: f32[1,128], index: 4, kind: input, shape index: {}]   ;;  %s1228_s8 = inlined_call_operand.<no memory space> [shape: f32[1,1], index: 8, kind: input, shape index: {}]   ;;  %s1229_s6 = inlined_call_operand.vmem [shape: f32[1,64], index: 6, kind: input, shape index: {}]   ;;  %s1230_s9 = inlined_call_operand.vmem [shape: f32[8,1], index: 9, kind: output, shape index: {}]  }
   0x1   :  { %v918_v0 = vld [vmem:[%s1221_s1 + $0x4] ss:$16 sps:$4 sm:$0xff]   ;;  %143 = vmatprep.mubr.bf16.mxu1 %v978_v1  ;;  %v920_v2 = vld [vmem:[%s1221_s1] ss:$16 sps:$4 sm:$0xff]   ;;  %v926_v6 = vld [vmem:[%s1221_s1 + $0xc] ss:$16 sps:$4 sm:$0xff]  }
   0x2   :  { %111 = vmatprep.subr.bf16.mxu1 %v918_v0  ;;  %v921_v3 = vld [vmem:[%s1221_s1 + $0x24] ss:$16 sps:$4 sm:$0xff]   ;;  %v923_v4 = vld [vmem:[%s1221_s1 + $0x20] ss:$16 sps:$4 sm:$0xff]   ;;  %v924_v7 = vld [vmem:[%s1221_s1 + $0x8] ss:$16 sps:$4 sm:$0xff]  }
   0x3   :  { %112 = vmatpush1.bf16.msra.mxu1 %v920_v2  ;;  %v35_v5 = vld [vmem:[%s1222_s0] sm:$0xff]  ;;  %v929_v9 = vld [vmem:[%s1221_s1 + $0x2c] ss:$16 sps:$4 sm:$0xff]   ;;  %v934_v14 = vld [vmem:[%s1223_s3 + $0x50] sm:$0xff]   ;;  %v48_v45 = vshrl.u32 %v47_v44, 7  ;;  %vm980_vm5 = vmmov 0   ;;  %v14_v44 = vstv %s1228_s8 }
   0x4   :  { %113 = vmatprep.subr.bf16.mxu1 %v921_v3  ;;  %v36_v8 = vpack.c.bf16 %v35_v5, %v35_v5  ;;  %v930_v10 = vld [vmem:[%s1223_s3 + $0x40] sm:$0xff]   ;;  %v932_v12 = vld [vmem:[%s1223_s3 + $0x48] sm:$0xff]   ;;  %v936_v17 = vld [vmem:[%s1223_s3 + $0x10] sm:$0xff]   ;;  %15 = vst [vmem:[#allocation2] sm:$0x1] %v14_v44  ;;  %vm710_vm8 = vcmask 523264  }
   0x5   :  { %v931_v11 = vld [vmem:[%s1223_s3] sm:$0xff]   ;;  %825 = vmatprep.subr.bf16.mxu0 %v930_v10  ;;  %v933_v13 = vld [vmem:[%s1223_s3 + $0x8] sm:$0xff]   ;;  %v938_v18 = vld [vmem:[%s1223_s3 + $0x58] sm:$0xff]   ;;  %v49_v46 = vsub.s32 0, %v48_v45  ;;  %v53_v48 = vsub.s32 1, %v48_v45  ;;  %v57_v54 = vsub.s32 2, %v48_v45 }
   0x6   :  { %826 = vmatpush3.bf16.msra.mxu0 %v931_v11  ;;  %v927_v15 = vld [vmem:[%s1221_s1 + $0x28] ss:$16 sps:$4 sm:$0xff]   ;;  %v935_v16 = vld [vmem:[%s1223_s3 + $0xc0] sm:$0xff]   ;;  %v943_v24 = vld [vmem:[%s1223_s3 + $0xd0] sm:$0xff]   ;;  %v61_v57 = vsub.s32 3, %v48_v45  ;;  %vm760_vm9 = vcmask 7168  }
   0x7   :  { %114 = vmatpush1.bf16.msra.mxu1 %v923_v4  ;;  %827 = vmatprep.subr.bf16.mxu0 %v932_v12  ;;  %v937_v19 = vld [vmem:[%s1223_s3 + $0x80] sm:$0xff]   ;;  %v939_v20 = vld [vmem:[%s1223_s3 + $0xc8] sm:$0xff]   ;;  %v940_v21 = vld [vmem:[%s1223_s3 + $0x18] sm:$0xff]  }
   0x8   :  { %152 = vmatprep.subr.bf16.mxu1 %v926_v6  ;;  %v942_v22 = vld [vmem:[%s1223_s3 + $0x60] sm:$0xff]   ;;  %v941_v23 = vld [vmem:[%s1223_s3 + $0x88] sm:$0xff]   ;;  %v945_v27 = vld [vmem:[%s1223_s3 + $0x90] sm:$0xff]  }
   0x9   :  { %v944_v25 = vld [vmem:[%s1223_s3 + $0x20] sm:$0xff]   ;;  %v946_v26 = vld [vmem:[%s1223_s3 + $0x68] sm:$0xff]   ;;  %v947_v28 = vld [vmem:[%s1223_s3 + $0xd8] sm:$0xff]  }
   0xa   :  { %774 = vmatmul.mubr.msk.bf16.vlgmr.msra.gmra.mrb[0].mxu1 %vm107_vm0, %v36_v8  ;;  %828 = vmatpush3.bf16.msra.mxu0 %v933_v13  ;;  %v948_v29 = vld [vmem:[%s1223_s3 + $0x28] sm:$0xff]   ;;  %v949_v30 = vld [vmem:[%s1223_s3 + $0x98] sm:$0xff]   ;;  %v950_v31 = vld [vmem:[%s1223_s3 + $0x70] sm:$0xff]  }
   0xb   :  { %153 = vmatpush1.bf16.msra.mxu1 %v924_v7  ;;  %184 = vmatprep.mubr.bf16.mxu1 %v978_v1  ;;  %v951_v32 = vld [vmem:[%s1223_s3 + $0xe0] sm:$0xff]   ;;  %v952_v33 = vld [vmem:[%s1223_s3 + $0x30] sm:$0xff]   ;;  %v954_v35 = vld [vmem:[%s1223_s3 + $0x78] sm:$0xff]  }
   0xc   :  { %154 = vmatprep.subr.bf16.mxu1 %v929_v9  ;;  %829 = vmatprep.subr.bf16.mxu0 %v934_v14  ;;  %v953_v34 = vld [vmem:[%s1223_s3 + $0xa0] sm:$0xff]   ;;  %v955_v36 = vld [vmem:[%s1223_s3 + $0xe8] sm:$0xff]   ;;  %v956_v37 = vld [vmem:[%s1223_s3 + $0x38] sm:$0xff]  }
   0xd   :  { %v957_v38 = vld [vmem:[%s1223_s3 + $0xa8] sm:$0xff]   ;;  %v958_v39 = vld [vmem:[%s1223_s3 + $0xf0] sm:$0xff]   ;;  %v960_v41 = vld [vmem:[%s1223_s3 + $0xf8] sm:$0xff]  }
   0xe   :  { %830 = vmatpush3.bf16.msra.mxu0 %v936_v17  ;;  %v959_v40 = vld [vmem:[%s1223_s3 + $0xb0] sm:$0xff]   ;;  %v961_v42 = vld [vmem:[%s1223_s3 + $0xb8] sm:$0xff]   ;;  %v45_v47 = vld [vmem:[%s1225_s2] sm:$0xf] }
   0xf   :  { %155 = vmatpush1.bf16.msra.mxu1 %v927_v15  ;;  %831 = vmatprep.subr.bf16.mxu0 %v938_v18  ;;  %v50_v49 = vrot.slane %v45_v47, %v49_v46  ;;  %v54_v50 = vrot.slane %v45_v47, %v53_v48  ;;  %v58_v61 = vrot.slane %v45_v47, %v57_v54  ;;  %v962_v2 = vld [vmem:[%s1224_s5] sm:$0xff]   ;;  %v963_v11 = vld [vmem:[%s1224_s5 + $0x8] sm:$0xff]   ;;  %v965_v18 = vld [vmem:[%s1224_s5 + $0x18] sm:$0xff]  }
  0x10   :  { %847 = vmatprep.subr.bf16.mxu1 %v935_v16  ;;  %v62_v63 = vrot.slane %v45_v47, %v61_v57  ;;  %v964_v16 = vld [vmem:[%s1224_s5 + $0x10] sm:$0xff]   ;;  %v809_v45 = vld [vmem:[%s1229_s6] ss:$0 sm:$0xff] }
  0x12   :  { %775 = vmatmul.mubr.msk.bf16.vlgmr.msra.gmra.mrb[4].mxu1 %vm107_vm0, %v36_v8  ;;  %832 = vmatpush3.bf16.msra.mxu0 %v940_v21  ;;  %v968_v21 = vld [vmem:[%s1224_s5 + $0x30] sm:$0xff]  }
  0x13   :  { %848 = vmatpush3.bf16.msra.mxu1 %v937_v19  ;;  %833 = vmatprep.subr.bf16.mxu0 %v942_v22  ;;  %v966_v19 = vld [vmem:[%s1224_s5 + $0x20] sm:$0xff]   ;;  %v969_v22 = vld [vmem:[%s1224_s5 + $0x38] sm:$0xff]  }
  0x14   :  { %849 = vmatprep.subr.bf16.mxu1 %v939_v20  ;;  %v967_v20 = vld [vmem:[%s1224_s5 + $0x28] sm:$0xff]  }
  0x16   :  { %834 = vmatpush3.bf16.msra.mxu0 %v944_v25 }
  0x17   :  { %850 = vmatpush3.bf16.msra.mxu1 %v941_v23  ;;  %835 = vmatprep.subr.bf16.mxu0 %v946_v26  ;;  %v970_v23 = vld [vmem:[%s1226_s7] sm:$0xff]  }
  0x18   :  { %851 = vmatprep.subr.bf16.mxu1 %v943_v24  ;;  %v971_v24 = vld [vmem:[%s1226_s7 + $0x8] sm:$0xff]  }
  0x1a   :  { %836 = vmatpush3.bf16.msra.mxu0 %v948_v29 }
  0x1b   :  { %852 = vmatpush3.bf16.msra.mxu1 %v945_v27  ;;  %837 = vmatprep.subr.bf16.mxu0 %v950_v31 }
  0x1c   :  { %853 = vmatprep.subr.bf16.mxu1 %v947_v28 }
  0x1e   :  { %838 = vmatpush3.bf16.msra.mxu0 %v952_v33 }
  0x1f   :  { %854 = vmatpush3.bf16.msra.mxu1 %v949_v30  ;;  %839 = vmatprep.subr.bf16.mxu0 %v954_v35  ;;  %v776_v30 = vld [vmem:[%s1227_s4] ss:$0 sm:$0xff] }
  0x20   :  { %855 = vmatprep.subr.bf16.mxu1 %v951_v32 }
  0x22   :  { %840 = vmatpush3.bf16.msra.mxu0 %v956_v37 }
  0x23   :  { %856 = vmatpush3.bf16.msra.mxu1 %v953_v34  ;;  %883 = vmatprep.subr.bf16.mxu0 %v979_v43 }
  0x24   :  { %857 = vmatprep.subr.bf16.mxu1 %v955_v36 }
  0x27   :  { %858 = vmatpush3.bf16.msra.mxu1 %v957_v38 }
  0x28   :  { %859 = vmatprep.subr.bf16.mxu1 %v958_v39 }
  0x2b   :  { %860 = vmatpush3.bf16.msra.mxu1 %v959_v40 }
  0x2c   :  { %861 = vmatprep.subr.bf16.mxu1 %v960_v41  ;;  %v972_v41 = vld [vmem:[%s1226_s7 + $0x10] sm:$0xff]  }
  0x2f   :  { %862 = vmatpush3.bf16.msra.mxu1 %v961_v42  ;;  %v973_v42 = vld [vmem:[%s1226_s7 + $0x18] sm:$0xff]  }
  0x30   :  { %903 = vmatprep.subr.bf16.mxu1 %v979_v43 }
  0xdd   :  { %v145_v51 = vpop.f32.mrb[0].mxu1 }
  0xde   :  { %v146_v52 = vadd.f32 %v145_v51, %v50_v49  ;;  %v147_v53 = vpop.f32.mrb[1].mxu1 }
  0xdf   :  { %v148_v55 = vadd.f32 %v147_v53, %v54_v50  ;;  %v149_v56 = vpop.f32.mrb[2].mxu1  ;;  %v818_v53 = vld [vmem:[#allocation2] ss:$0 sm:$0xff] }
  0xe0   :  { %vm193_vm1 = vcmp.ge.f32.partialorder %v146_v52, 0.0  ;;  %v197_v58 = vmul.f32 0.01, %v146_v52  ;;  %v150_v59 = vpop.f32.mrb[3].mxu1 }
  0xe1   :  { %vm194_vm2 = vcmp.ge.f32.partialorder %v148_v55, 0.0  ;;  %v198_v60 = vmul.f32 0.01, %v148_v55 }
  0xe2   :  { %v201_v62 = vsel %vm193_vm1, %v146_v52, %v197_v58 }
  0xe3   :  { %v202_v0 = vsel %vm194_vm2, %v148_v55, %v198_v60  ;;  %v205_v4 = vpack.c.bf16 %v201_v62, %v201_v62 }
  0xe4   :  { %v206_v1 = vpack.c.bf16 %v202_v0, %v202_v0 }
  0xe5   :  { %v186_v3 = vpop.f32.mrb[4].mxu1 }
  0xe6   :  { %v187_v5 = vadd.f32 %v186_v3, %v58_v61  ;;  %v188_v6 = vpop.f32.mrb[5].mxu1  ;;  %504 = vmatprep.mubr.bf16.mxu0 %v206_v1 }
  0xe7   :  { %v189_v7 = vadd.f32 %v188_v6, %v62_v63  ;;  %v190_v8 = vpop.f32.mrb[6].mxu1  ;;  %505 = vmatmul.mubr.bf16.vlgmr.msra.gmra.mrb[0].mxu0 %v205_v4 }
  0xe8   :  { %vm195_vm3 = vcmp.ge.f32.partialorder %v187_v5, 0.0  ;;  %v199_v9 = vmul.f32 0.01, %v187_v5  ;;  %v191_v10 = vpop.f32.mrb[7].mxu1  ;;  %884 = vmatpush3.bf16.msra.mxu0 %v962_v2  ;;  %899 = vmatprep.mubr.msk.bf16.mxu0 %vm980_vm5, %v979_v43 }
  0xe9   :  { %vm196_vm4 = vcmp.ge.f32.partialorder %v189_v7, 0.0  ;;  %v200_v12 = vmul.f32 0.01, %v189_v7  ;;  %885 = vmatprep.subr.bf16.mxu0 %v979_v43 }
  0xea   :  { %v203_v13 = vsel %vm195_vm3, %v187_v5, %v199_v9 }
  0xeb   :  { %v204_v14 = vsel %vm196_vm4, %v189_v7, %v200_v12  ;;  %v207_v17 = vpack.c.bf16 %v203_v13, %v203_v13 }
  0xec   :  { %v208_v15 = vpack.c.bf16 %v204_v14, %v204_v14  ;;  %886 = vmatpush3.bf16.msra.mxu0 %v963_v11 }
  0xed   :  { %887 = vmatprep.subr.bf16.mxu0 %v979_v43 }
  0xee   :  { %544 = vmatprep.mubr.bf16.mxu1 %v208_v15 }
  0xef   :  { %545 = vmatmul.mubr.bf16.vlgmr.msra.gmra.mrb[8].mxu1 %v207_v17 }
  0xf0   :  { %888 = vmatpush3.bf16.msra.mxu0 %v964_v16  ;;  %911 = vmatprep.mubr.msk.bf16.mxu1 %vm980_vm5, %v979_v43 }
  0xf1   :  { %889 = vmatprep.subr.bf16.mxu0 %v979_v43  ;;  %904 = vmatpush3.bf16.msra.mxu1 %v970_v23 }
  0xf2   :  { %905 = vmatprep.subr.bf16.mxu1 %v979_v43 }
  0xf4   :  { %890 = vmatpush3.bf16.msra.mxu0 %v965_v18 }
  0xf5   :  { %891 = vmatprep.subr.bf16.mxu0 %v979_v43  ;;  %906 = vmatpush3.bf16.msra.mxu1 %v971_v24 }
  0xf6   :  { %907 = vmatprep.subr.bf16.mxu1 %v979_v43 }
  0xf8   :  { %892 = vmatpush3.bf16.msra.mxu0 %v966_v19 }
  0xf9   :  { %893 = vmatprep.subr.bf16.mxu0 %v979_v43  ;;  %908 = vmatpush3.bf16.msra.mxu1 %v972_v41 }
  0xfa   :  { %909 = vmatprep.subr.bf16.mxu1 %v979_v43 }
  0xfc   :  { %894 = vmatpush3.bf16.msra.mxu0 %v967_v20 }
  0xfd   :  { %895 = vmatprep.subr.bf16.mxu0 %v979_v43  ;;  %910 = vmatpush3.bf16.msra.mxu1 %v973_v42 }
 0x100   :  { %896 = vmatpush3.bf16.msra.mxu0 %v968_v21 }
 0x101   :  { %897 = vmatprep.subr.bf16.mxu0 %v979_v43 }
 0x104   :  { %898 = vmatpush3.bf16.msra.mxu0 %v969_v22 }
 0x1ba   :  { %v841_v25 = vpop.f32.mrb[0].mxu0 }
 0x1bb   :  { %v842_v26 = vpop.f32.mrb[1].mxu0 }
 0x1bc   :  { %v843_v27 = vadd.f32 %v842_v26, %v841_v25  ;;  %v844_v28 = vpop.f32.mrb[2].mxu0 }
 0x1bd   :  { %v845_v29 = vpop.f32.mrb[3].mxu0 }
 0x1be   :  { %v507_v33 = vadd.f32 %v843_v27, %v776_v30 }
 0x1c2   :  { %v863_v31 = vpop.f32.mrb[8].mxu1 }
 0x1c3   :  { %v864_v32 = vpop.f32.mrb[9].mxu1 }
 0x1c4   :  { %v865_v34 = vadd.f32 %v864_v32, %v863_v31  ;;  %v866_v35 = vpop.f32.mrb[10].mxu1 }
 0x1c5   :  { %v867_v36 = vpop.f32.mrb[11].mxu1 }
 0x1c6   :  { %v547_v37 = vadd.f32 %v865_v34, %v507_v33 }
 0x1c8   :  { %vm552_vm6 = vcmp.ge.f32.partialorder %v547_v37, 0.0  ;;  %v553_v38 = vmul.f32 0.01, %v547_v37 }
 0x1ca   :  { %v554_v39 = vsel %vm552_vm6, %v547_v37, %v553_v38 }
 0x1cb   :  { %v555_v40 = vpack.c.bf16 %v554_v39, %v554_v39 }
 0x1cd   :  { %900 = vmatmul.mubr.bf16.vlgmr.msra.gmra.mrb[4].mxu0 %v555_v40 }
 0x2a0   :  { %v661_v46 = vpop.f32.mrb[4].mxu0 }
 0x2a1   :  { %v662_v47 = vadd.f32 %v809_v45, %v661_v46  ;;  %v901_v48 = vpop.f32.mrb[5].mxu0 }
 0x2a2   :  { %v664_v49 = vpop.f32.mrb[6].mxu0 }
 0x2a3   :  { %vm667_vm7 = vcmp.ge.f32.partialorder %v662_v47, 0.0  ;;  %v668_v43 = vmul.f32 0.01, %v662_v47  ;;  %v902_v50 = vpop.f32.mrb[7].mxu0 }
 0x2a5   :  { %v669_v51 = vsel %vm667_vm7, %v662_v47, %v668_v43 }
 0x2a6   :  { %v670_v52 = vpack.c.bf16 %v669_v51, %v669_v51 }
 0x2a8   :  { %912 = vmatmul.mubr.msk.bf16.vlgmr.msra.gmra.mrb[12].mxu1 %vm710_vm8, %v670_v52 }
 0x37b   :  { %v748_v54 = vpop.f32.mrb[12].mxu1 }
 0x37c   :  { %v749_v55 = vadd.f32 %v818_v53, %v748_v54  ;;  %v913_v56 = vpop.f32.mrb[13].mxu1 }
 0x37d   :  { %v751_v57 = vpop.f32.mrb[14].mxu1 }
 0x37e   :  { %v824_v58 = vmul.f32 -1.442695, %v749_v55  ;;  %v914_v59 = vpop.f32.mrb[15].mxu1 }
 0x380   :  { %974 = vpow2.f32 %v824_v58 }
 0x38a   :  { %v975_v60 = vpop.eup %974 }
 0x38b   :  { %v757_v61 = vadd.f32 1.0, %v975_v60 }
 0x38d   :  { %976 = vrcp.f32 %v757_v61 }
 0x397   :  { %v977_v62 = vpop.eup %976 }
 0x398   :  { %761 = vst.msk [vmem:[%s1230_s9] sm:$0xff] %vm760_vm9, %v977_v62 }

</bundles_post_ra>
